<compile_context>
chip_gen: v7x
topology: tpu7x:2x2x1
jax: 0.10.0
libtpu: 0.0.40
codegen_flags: <defaults>
</compile_context>

<pallas_src>
import numpy as np
import jax
import jax.numpy as jnp
from jax.experimental import pallas as pl
from jax.experimental.pallas import tpu as pltpu

# ---------------------------------------------------------------------------
# Static configuration (small synthetic shapes consistent with the module).
# ---------------------------------------------------------------------------
B, CIN, H, W = 2, 4, 16, 16      # input x : (B, CIN, H, W)  NCHW
STRIDE = 2                       # backbone output stride
HF, WF = H // STRIDE, W // STRIDE
CF = 8                           # backbone feature channels
NCLS = 6                         # classifier output channels (num classes)
PIXF = HF * WF                   # feature pixels per image   (64)
HW = H * W                       # output pixels per image    (256)

# TODO(synk): backbone/classifier are arbitrary injected nn.Modules in the
# PyTorch spec; synthetic 1x1-conv stand-ins are instantiated here.


# ---------------------------------------------------------------------------
# Bilinear interpolation matrices (align_corners=False), built once at import
# time with numpy and fused into a single shared kron matrix (bf16 MXU operand).
# ---------------------------------------------------------------------------
def _bilinear_matrix_np(out_size: int, in_size: int) -> np.ndarray:
    """M (out, in) matching F.interpolate(mode='bilinear', align_corners=False):
    out = M @ in along one spatial axis."""
    scale = in_size / out_size
    i = np.arange(out_size, dtype=np.float64)
    src = np.maximum((i + 0.5) * scale - 0.5, 0.0)   # PyTorch clamps negative src
    i0 = np.clip(np.floor(src).astype(np.int64), 0, in_size - 1)
    i1 = np.minimum(i0 + 1, in_size - 1)
    w1 = src - i0
    w0 = 1.0 - w1
    m = np.zeros((out_size, in_size), np.float64)
    rows = np.arange(out_size)
    np.add.at(m, (rows, i0), w0)
    np.add.at(m, (rows, i1), w1)
    return m.astype(np.float32)


_MH_NP = _bilinear_matrix_np(H, HF)                      # (H,  HF)
_MW_NP = _bilinear_matrix_np(W, WF)                      # (W,  WF)
_MT_NP = np.kron(_MH_NP, _MW_NP).T                       # (PIXF, HW) = (64, 256)
MT_BF16 = jnp.asarray(_MT_NP, dtype=jnp.bfloat16)        # shared across all images


# ---------------------------------------------------------------------------
# Pallas kernel. grid=(B,), one image per step.
#   xT_ref  : (CIN+1, PIXF)   channels (+ ones row) on sublanes, pixels on lanes
#   wbT_ref : (CF+1, CIN+1)   backbone 1x1 conv weight | bias column | ones-row
#   wcT_ref : (NCLS, CF+1)    classifier 1x1 conv weight | bias column
#   mt_ref  : (PIXF, HW)      shared kron(mh, mw)^T upsample matrix, bf16
#   o_ref   : (NCLS, HW)      NCHW-flattened output slab for this image
# ---------------------------------------------------------------------------
def seg_kernel(xT_ref, wbT_ref, wcT_ref, mt_ref, o_ref):
    # backbone 1x1 conv (bias folded via ones row) + ReLU : (CF+1, PIXF)
    # (row CF stays an all-ones row: relu(1) = 1, used to fold the classifier bias)
    feat = jnp.dot(wbT_ref[...], xT_ref[...], preferred_element_type=jnp.float32)
    feat = jnp.maximum(feat, 0.0)

    # classifier 1x1 conv (bias folded via ones row of feat) : (NCLS, PIXF)
    logits = jnp.dot(wcT_ref[...], feat, preferred_element_type=jnp.float32)

    # fused bilinear upsample, bf16 MXU operands, f32 accumulation : (NCLS, HW)
    up = jnp.dot(logits.astype(jnp.bfloat16), mt_ref[...],
                 preferred_element_type=jnp.float32)

    # lane-dense (256-wide, tile-aligned) store; already NCHW order.
    o_ref[...] = up


@jax.jit
def simple_segmentation_forward(x_nchw, wb, bb, wc, bc):
    """Full forward. Returns NCHW (B, NCLS, H, W), matching the PyTorch module."""
    # glue: backbone stride-2 pixel selection; channels -> sublanes, pixels -> lanes;
    # append a ones row so the backbone bias is folded into the matmul.
    xs = x_nchw[:, :, ::STRIDE, ::STRIDE].reshape(B, CIN, PIXF)     # (B, CIN, PIXF)
    ones = jnp.ones((B, 1, PIXF), jnp.float32)
    xT_aug = jnp.concatenate([xs, ones], axis=1)                    # (B, CIN+1, PIXF)

    # backbone weight with bias column + an extra row that regenerates the ones
    # row (so the classifier bias folds into the second matmul too).
    ones_row = jnp.zeros((1, CIN + 1), jnp.float32).at[0, CIN].set(1.0)
    wbT_full = jnp.concatenate(
        [jnp.concatenate([wb.T, bb.T], axis=1), ones_row], axis=0)  # (CF+1, CIN+1)
    wcT_full = jnp.concatenate([wc.T, bc.T], axis=1)                # (NCLS, CF+1)

    out = pl.pallas_call(
        seg_kernel,
        out_shape=jax.ShapeDtypeStruct((B, NCLS, HW), jnp.float32),
        grid=(B,),
        in_specs=[
            pl.BlockSpec((None, CIN + 1, PIXF), lambda b: (b, 0, 0)),  # per-image x
            pl.BlockSpec((CF + 1, CIN + 1), lambda b: (0, 0)),         # shared weights
            pl.BlockSpec((NCLS, CF + 1), lambda b: (0, 0)),
            pl.BlockSpec((PIXF, HW), lambda b: (0, 0)),                # shared upsample
        ],
        out_specs=pl.BlockSpec((None, NCLS, HW), lambda b: (b, 0, 0)),
        compiler_params=pltpu.CompilerParams(
            dimension_semantics=("parallel",)),                       # 2 TCs on v7x
    )(xT_aug, wbT_full, wcT_full, MT_BF16)

    # (B, NCLS, HW) is already NCHW; splitting the last dim is a free reshape.
    return out.reshape(B, NCLS, H, W)


def reference_forward(x_nchw, wb, bb, wc, bc):
    """Plain-JAX f32 reference of the same math (separable upsample) for validation."""
    xs = x_nchw[:, :, ::STRIDE, ::STRIDE]
    xs = jnp.transpose(xs, (0, 2, 3, 1)).reshape(B, PIXF, CIN)
    feat = jnp.maximum(xs @ wb + bb, 0.0)
    logits = (feat @ wc + bc).reshape(B, HF, WF, NCLS)
    mh = jnp.asarray(_MH_NP)
    mw = jnp.asarray(_MW_NP)
    up = jnp.einsum('Oh,bhwc->bOwc', mh, logits)
    up = jnp.einsum('Pw,bhwc->bhPc', mw, up)
    return jnp.transpose(up, (0, 3, 1, 2))


if __name__ == "__main__":
    key = jax.random.PRNGKey(0)
    kx, k1, k2, k3, k4 = jax.random.split(key, 5)

    x = jax.random.normal(kx, (B, CIN, H, W), jnp.float32)
    wb = 0.1 * jax.random.normal(k1, (CIN, CF), jnp.float32)   # backbone 1x1 conv
    bb = 0.1 * jax.random.normal(k2, (1, CF), jnp.float32)
    wc = 0.1 * jax.random.normal(k3, (CF, NCLS), jnp.float32)  # classifier 1x1 conv
    bc = 0.1 * jax.random.normal(k4, (1, NCLS), jnp.float32)

    out = jax.block_until_ready(simple_segmentation_forward(x, wb, bb, wc, bc))
    ref = jax.block_until_ready(reference_forward(x, wb, bb, wc, bc))

    assert out.shape == (B, NCLS, H, W), out.shape
    # tolerance loosened for the bf16 upsample operands (f32 accumulation kept).
    assert jnp.max(jnp.abs(out - ref)) < 2e-2, float(jnp.max(jnp.abs(out - ref)))
    print("KERNEL_OK")
</pallas_src>

<mosaic_0001>
module attributes {stable_mosaic.version = 11 : i64} {
  func.func @seg_kernel(%arg0: i32, %arg1: memref<1x5x64xf32, #tpu.memory_space<vmem>>, %arg2: memref<9x5xf32, #tpu.memory_space<vmem>>, %arg3: memref<6x9xf32, #tpu.memory_space<vmem>>, %arg4: memref<64x256xbf16, #tpu.memory_space<vmem>>, %arg5: memref<1x6x256xf32, #tpu.memory_space<vmem>>) attributes {dimension_semantics = [#tpu.dimension_semantics<parallel>], iteration_bounds = array<i64: 2>, scalar_prefetch = 0 : i64, scratch_operands = 0 : i64, tpu.core_type = #tpu.core_type<tc>, window_params = [{transform_indices = @transform_0, window_bounds = array<i64: 1, 5, 64>}, {pipeline_mode = #tpu.pipeline_mode<synchronous>, transform_indices = @transform_1, window_bounds = array<i64: 9, 5>}, {pipeline_mode = #tpu.pipeline_mode<synchronous>, transform_indices = @transform_2, window_bounds = array<i64: 6, 9>}, {pipeline_mode = #tpu.pipeline_mode<synchronous>, transform_indices = @transform_3, window_bounds = array<i64: 64, 256>}, {transform_indices = @transform_4, window_bounds = array<i64: 1, 6, 256>}]} {
    %c0 = arith.constant 0 : index
    %c0_0 = arith.constant 0 : index
    %0 = vector.load %arg2[%c0, %c0_0] : memref<9x5xf32, #tpu.memory_space<vmem>>, vector<9x5xf32>
    %c0_1 = arith.constant 0 : index
    %c0_2 = arith.constant 0 : index
    %c0_3 = arith.constant 0 : index
    %1 = vector.load %arg1[%c0_1, %c0_2, %c0_3] : memref<1x5x64xf32, #tpu.memory_space<vmem>>, vector<1x5x64xf32>
    %2 = vector.shape_cast %1 : vector<1x5x64xf32> to vector<5x64xf32>
    %cst = arith.constant dense<0.000000e+00> : vector<9x64xf32>
    %3 = tpu.matmul %0, %2, %cst {dimension_numbers = #tpu.dot_dimension_numbers<[1], [0], [0], [1], [0, 0, 1, 1], [], []>} : vector<9x5xf32>, vector<5x64xf32>, vector<9x64xf32> -> vector<9x64xf32>
    %cst_4 = arith.constant 0.000000e+00 : f32
    %4 = vector.broadcast %cst_4 : f32 to vector<9x64xf32>
    %5 = arith.maximumf %3, %4 : vector<9x64xf32>
    %c0_5 = arith.constant 0 : index
    %c0_6 = arith.constant 0 : index
    %6 = vector.load %arg3[%c0_5, %c0_6] : memref<6x9xf32, #tpu.memory_space<vmem>>, vector<6x9xf32>
    %cst_7 = arith.constant dense<0.000000e+00> : vector<6x64xf32>
    %7 = tpu.matmul %6, %5, %cst_7 {dimension_numbers = #tpu.dot_dimension_numbers<[1], [0], [0], [1], [0, 0, 1, 1], [], []>} : vector<6x9xf32>, vector<9x64xf32>, vector<6x64xf32> -> vector<6x64xf32>
    %8 = arith.truncf %7 : vector<6x64xf32> to vector<6x64xbf16>
    %c0_8 = arith.constant 0 : index
    %c0_9 = arith.constant 0 : index
    %9 = vector.load %arg4[%c0_8, %c0_9] : memref<64x256xbf16, #tpu.memory_space<vmem>>, vector<64x256xbf16>
    %cst_10 = arith.constant dense<0.000000e+00> : vector<6x256xf32>
    %10 = tpu.matmul %8, %9, %cst_10 {dimension_numbers = #tpu.dot_dimension_numbers<[1], [0], [0], [1], [0, 0, 1, 1], [], []>} : vector<6x64xbf16>, vector<64x256xbf16>, vector<6x256xf32> -> vector<6x256xf32>
    %c0_11 = arith.constant 0 : index
    %c0_12 = arith.constant 0 : index
    %c0_13 = arith.constant 0 : index
    %11 = vector.load %arg5[%c0_11, %c0_12, %c0_13] : memref<1x6x256xf32, #tpu.memory_space<vmem>>, vector<1x6x256xf32>
    %12 = vector.shape_cast %11 : vector<1x6x256xf32> to vector<6x256xf32>
    %13 = vector.shape_cast %10 : vector<6x256xf32> to vector<1x6x256xf32>
    tpu.vector_store %arg5[%c0_11, %c0_12, %c0_13], %13 {strides = array<i32>} : memref<1x6x256xf32, #tpu.memory_space<vmem>>, vector<1x6x256xf32>,
    return
  }
  func.func @transform_0(%arg0: i32) -> (i32, i32, i32) {
    %c0_i32 = arith.constant 0 : i32
    %c0_i32_0 = arith.constant 0 : i32
    %c0_i32_1 = arith.constant 0 : i32
    return %arg0, %c0_i32, %c0_i32_0 : i32, i32, i32
  }
  func.func @transform_1(%arg0: i32) -> (i32, i32) {
    %c0_i32 = arith.constant 0 : i32
    %c0_i32_0 = arith.constant 0 : i32
    %c0_i32_1 = arith.constant 0 : i32
    return %c0_i32, %c0_i32_0 : i32, i32
  }
  func.func @transform_2(%arg0: i32) -> (i32, i32) {
    %c0_i32 = arith.constant 0 : i32
    %c0_i32_0 = arith.constant 0 : i32
    %c0_i32_1 = arith.constant 0 : i32
    return %c0_i32, %c0_i32_0 : i32, i32
  }
  func.func @transform_3(%arg0: i32) -> (i32, i32) {
    %c0_i32 = arith.constant 0 : i32
    %c0_i32_0 = arith.constant 0 : i32
    %c0_i32_1 = arith.constant 0 : i32
    return %c0_i32, %c0_i32_0 : i32, i32
  }
  func.func @transform_4(%arg0: i32) -> (i32, i32, i32) {
    %c0_i32 = arith.constant 0 : i32
    %c0_i32_0 = arith.constant 0 : i32
    %c0_i32_1 = arith.constant 0 : i32
    return %arg0, %c0_i32, %c0_i32_0 : i32, i32, i32
  }
}

</mosaic_0001>

<bundles_post_ra>
// kernel: simple_segmentation_forward.1
= control target key start
LH: loop header
LB: loop body
LE: loop exit
PB: predicated region body
PF: predicated region fallthrough
CT: control target
= control target key end

     0   :  { %s627_s15 = smov 0   ;;  %s681_s0 = inlined_call_operand.vmem [shape: f32[2,5,64], index: 0, kind: input, shape index: {}]   ;;  %s682_s1 = inlined_call_operand.vmem [shape: f32[9,5], index: 1, kind: input, shape index: {}]   ;;  %s683_s2 = inlined_call_operand.vmem [shape: f32[6,9], index: 2, kind: input, shape index: {}]   ;;  %s684_s3 = inlined_call_operand.vmem [shape: bf16[64,256], index: 3, kind: input, shape index: {}]   ;;  %s685_s4 = inlined_call_operand.vmem [shape: f32[2,6,256], index: 4, kind: output, shape index: {}]  }
   0x1 LB: > { %s517_s16 = sadd.s32 4294967295, %s595_s15   ;;  %p521_p0 = scmp.ge.s32.totalorder %s595_s15, 1  ;;  %s595_s15 = sphi %s627_s15, %s14_s15  }
   0x2   : > { %p161_p1 = scmp.lt.s32.totalorder %s595_s15, 3 }
   0x4   : > { %p162_p2 = pnand %p521_p0, %p161_p1 }
   0x5   : > { %p186_p3 = scmp.lt.s32.totalorder (!%p162_p2), %s517_s16, 1  ;;  %v196_v0 = vld [vmem:[%s682_s1] sm:$0xff] (!%p162_p2)  ;;  %vm199_vm0 = vcmask (!%p162_p2), 39936   ;;  %vm206_vm1 = vcmask (!%p162_p2), 1044480   ;;  %v197_v2 = vld [vmem:[%s682_s1 + $0x8] sm:$0x1] (!%p162_p2) }
   0x6   : > { %165 = sbr.rel (%p162_p2) target bundleno = 668 (0x29c), region = 36  ;;  %550 = vmatprep.mubr.msk.f32.mxu1 (!%p162_p2), %vm199_vm0, %v196_v0  ;;  %v597_v3 = vmov (!%p162_p2), 0.0|0.0   ;;  %vm598_vm2 = vmmov (!%p162_p2), 0   ;;  %v599_v4 = vmov (!%p162_p2), 0.0   ;;  %v577_v5 = vld [vmem:[%s684_s3 + $0x4] ss:$8 sps:$4 sm:$0xff] (!%p162_p2)  }
   0x7   : > { %v579_v6 = vld [vmem:[%s684_s3] ss:$8 sps:$4 sm:$0xff] (!%p162_p2)   ;;  %v580_v7 = vld [vmem:[%s684_s3 + $0x14] ss:$8 sps:$4 sm:$0xff] (!%p162_p2)   ;;  %419 = vmatprep.subr.bf16.mxu0 (!%p162_p2), %v577_v5  ;;  %v582_v8 = vld [vmem:[%s684_s3 + $0x10] ss:$8 sps:$4 sm:$0xff] (!%p162_p2)  }
   0x8   : > { %420 = vmatpush1.bf16.msra.mxu0 (!%p162_p2), %v579_v6  ;;  %v583_v9 = vld [vmem:[%s684_s3 + $0x24] ss:$8 sps:$4 sm:$0xff] (!%p162_p2)   ;;  %v585_v10 = vld [vmem:[%s684_s3 + $0x20] ss:$8 sps:$4 sm:$0xff] (!%p162_p2)   ;;  %v586_v11 = vld [vmem:[%s684_s3 + $0x34] ss:$8 sps:$4 sm:$0xff] (!%p162_p2)  }
   0x9   : > { %421 = vmatprep.subr.bf16.mxu0 (!%p162_p2), %v580_v7  ;;  %vm292_vm3 = vcmask (!%p162_p2), 1040384   ;;  %vm600_vm4 = vmmov (!%p162_p2), 1   ;;  %v287_v17 = vld [vmem:[%s683_s2] sm:$0x3f] (!%p162_p2)  ;;  %vm288_vm6 = vcmask (!%p162_p2), 72704   ;;  %v601_v19 = vmov (!%p162_p2), 0  }
   0xa   : > { %vm562_vm5 = vmpackc.low (!%p162_p2), %vm292_vm3, %vm600_vm4  ;;  %v588_v18 = vld [vmem:[%s684_s3 + $0x30] ss:$8 sps:$4 sm:$0xff] (!%p162_p2)   ;;  %451 = vmatprep.mubr.bf16.mxu0 (!%p162_p2), %v601_v19  ;;  %vm415_vm7 = vcmask (!%p162_p2), 523264  }
   0xc   : > { %422 = vmatpush1.bf16.msra.mxu0 (!%p162_p2), %v582_v8 }
   0xd   : > { %s687_s16 = smov (!%p186_p3, %s517_s16), 1  ;;  %423 = vmatprep.subr.bf16.mxu0 %v583_v9 }
   0xe   : > { %s522_s19 = sshll.u32 %s687_s16, 3 }
   0xf   : > { %s189_s22 = scalar_lea.vmem %s681_s0, %s522_s19  ;;  %s541_s19 = sshll.u32 %s687_s16, 4 }
  0x10   : > { %v198_v1 = vld [vmem:[%s189_s22] sm:$0x1f]  ;;  %424 = vmatpush1.bf16.msra.mxu0 %v585_v10  ;;  %s194_s22 = scalar_lea.vmem %s685_s4, %s541_s19 }
  0x11   : > { %548 = vmatprep.subr.msk.mxu1 %vm206_vm1, %v198_v1  ;;  %425 = vmatprep.subr.bf16.mxu0 %v586_v11 }
  0x12   : > { %549 = vmatpush3.msk.msra.mxu1 %vm206_vm1, %v198_v1 }
  0x13   : > { %551 = vmatmul.mubr.msk.f32.vlgmr.msra.gmra.mrb[0].mxu1 %vm199_vm0, %v197_v2  ;;  %560 = vmatprep.subr.bf16.mxu1 %v597_v3 }
  0x14   : > { %557 = vmatprep.mubr.msk.f32.mxu1 %vm598_vm2, %v599_v4  ;;  %426 = vmatpush1.bf16.msra.mxu0 %v588_v18 }
  0xe6   : > { %v552_v12 = vpop.f32.mrb[0].mxu1 }
  0xe7   : > { %v286_v13 = vmax.f32 %v552_v12, 0.0  ;;  %v276_v14 = vpop.f32.mrb[1].mxu1 }
  0xe8   : > { %v285_v15 = vmax.f32 %v276_v14, 0.0 }
  0xea   : > { %v561_v16 = vpack.c.bf16 %v286_v13, %v285_v15 }
  0xec   : > { %563 = vmatpush3.bf16.msk.msra.mxu1 %vm562_vm5, %v561_v16 }
  0xef   : > { %558 = vmatmul.mubr.msk.f32.vlgmr.msra.gmra.mrb[2].mxu1 %vm288_vm6, %v287_v17 }
 0x1c2   : > { %v362_v20 = vpop.f32.mrb[2].mxu1 }
 0x1c3   : > { %v366_v21 = vpack.c.bf16 %v362_v20, %v362_v20  ;;  %v559_v22 = vpop.f32.mrb[3].mxu1 }
 0x1c5   : > { %538 = vmatmul.mubr.msk.bf16.vlgmr.msra.gmra.mrb[0].mxu0 %vm415_vm7, %v366_v21 }
 0x298   : > { %v453_v23 = vpop.f32.mrb[0].mxu0 }
 0x299   : > { %460 = vst [vmem:[%s194_s22] sm:$0x3f] %v453_v23  ;;  %v455_v24 = vpop.f32.mrb[1].mxu0 }
 0x29a   : > { %461 = vst [vmem:[%s194_s22 + $0x8] sm:$0x3f] %v455_v24  ;;  %v457_v25 = vpop.f32.mrb[2].mxu0 }
 0x29b   : > { %v458_v26 = vpop.f32.mrb[3].mxu0 }
 0x29c PF: > { %s14_s15 = sadd.s32 1, %s595_s15  }
 0x29d   : > { %p11_p4 = scmp.ge.s32.totalorder %s14_s15, 4  }
 0x29f   :  { %13 = sbr.rel (!%p11_p4) target bundleno = 1 (0x1), region = 66 }

</bundles_post_ra>
